<compile_context>
chip_gen: v7x
topology: tpu7x:2x2x1
jax: 0.10.0
libtpu: 0.0.40
codegen_flags: <defaults>
</compile_context>

<pallas_src>
import functools

import jax
import jax.numpy as jnp
from jax.experimental import pallas as pl
from jax.experimental.pallas import tpu as pltpu

# Logical (PyTorch) dims; padded contraction dims for MXU alignment.
D_IN, D_HID, D_OUT = 375, 500, 750
K_P, H_P = 384, 512          # 375 -> 384, 500 -> 512 (contraction dims only)


def _round_up(x, m):
    return ((x + m - 1) // m) * m


def _pad_to(arr, shape):
    pads = [(0, s - d) for d, s in zip(arr.shape, shape)]
    return jnp.pad(arr, pads)


def linear_expansion_kernel(x_ref, w1_ref, b1_ref, w2_ref, b2_ref, o_ref,
                            xb_ref, l1_ref):
    # Stage the (TB, 375) f32 tile into a K-padded bf16 buffer.  Re-zero every
    # step (cheap VMEM store) so pad columns are correct on BOTH cores when the
    # batch axis is megacore-sharded (program_id==0 may never run on core 1).
    xb_ref[...] = jnp.zeros_like(xb_ref)
    xb_ref[:, :D_IN] = x_ref[...].astype(jnp.bfloat16)

    # linear1: (TB, 384) @ (384, 512) -> f32 accumulate, add bias, stash bf16.
    l1 = jnp.dot(xb_ref[...], w1_ref[...],
                 preferred_element_type=jnp.float32) + b1_ref[...]
    l1_ref[...] = l1.astype(jnp.bfloat16)

    # linear2: (TB, 512) @ (512, 750) -> f32 accumulate, add bias, store.
    # Only the final (partial) vreg column of the 750-wide store is masked.
    l2 = jnp.dot(l1_ref[...], w2_ref[...],
                 preferred_element_type=jnp.float32) + b2_ref[...]
    o_ref[...] = l2.astype(o_ref.dtype)


def prepare_params(w1, b1, w2, b2):
    """One-time pad + bf16 cast of the weights.

    w1: (375, 500), b1: (500,), w2: (500, 750), b2: (750,), all stored as
    (in, out) == W.T so the kernel computes x @ W.T + b like torch.nn.Linear.
    Zero-padding the contraction dims is exact (zero rows of W, zero bias).
    """
    w1_p = _pad_to(w1, (K_P, H_P)).astype(jnp.bfloat16)            # (384, 512)
    b1_p = _pad_to(b1.reshape(1, -1), (1, H_P)).astype(jnp.float32)  # (1, 512)
    w2_p = _pad_to(w2, (H_P, D_OUT)).astype(jnp.bfloat16)          # (512, 750)
    b2_p = b2.reshape(1, -1).astype(jnp.float32)                   # (1, 750)
    return w1_p, b1_p, w2_p, b2_p


@functools.partial(jax.jit, static_argnames=("tb_max",))
def linear_expansion(x, w1_p, b1_p, w2_p, b2_p, tb_max=1024):
    """x: (B, 375) f32; padded params from `prepare_params`. Returns (B, 750) f32."""
    B = x.shape[0]
    if B == 0:  # shape is static under jit, so this Python guard is safe
        return jnp.zeros((0, D_OUT), jnp.float32)
    if x.dtype != jnp.float32:
        x = x.astype(jnp.float32)

    # Tile selection: minimize masked rows, cap for VMEM, and force >= 2 grid
    # steps when the batch is big enough so the "parallel" axis can shard
    # across both v7x TensorCores.
    n_tiles = max(2, pl.cdiv(B, tb_max)) if B >= 32 else 1
    TB = min(_round_up(pl.cdiv(B, n_tiles), 16), tb_max)
    grid = (pl.cdiv(B, TB),)

    flops = 2 * grid[0] * TB * (K_P * H_P + H_P * D_OUT)
    bytes_accessed = (B * D_IN * 4 + K_P * H_P * 2 + H_P * D_OUT * 2
                      + H_P * 4 + D_OUT * 4 + B * D_OUT * 4)

    out = pl.pallas_call(
        linear_expansion_kernel,
        out_shape=jax.ShapeDtypeStruct((B, D_OUT), jnp.float32),
        grid_spec=pltpu.PrefetchScalarGridSpec(
            num_scalar_prefetch=0,
            grid=grid,
            in_specs=[
                # x: tiled over batch, pipelined; last dim = full dim (375).
                pl.BlockSpec((TB, D_IN), lambda i: (i, 0)),
                # Weights / biases: constant index_map -> DMA'd once, resident.
                # TODO(synk): mark these pipeline_mode=pl.Buffered(1) to drop the
                # unused second buffer (~1.1 MiB) once that path is exercised.
                pl.BlockSpec((K_P, H_P), lambda i: (0, 0)),
                pl.BlockSpec((1, H_P), lambda i: (0, 0)),
                pl.BlockSpec((H_P, D_OUT), lambda i: (0, 0)),
                pl.BlockSpec((1, D_OUT), lambda i: (0, 0)),
            ],
            # Output emitted directly at logical width 750 (full dim), no slice.
            out_specs=pl.BlockSpec((TB, D_OUT), lambda i: (i, 0)),
            scratch_shapes=[
                pltpu.VMEM((TB, K_P), jnp.bfloat16),   # K-padded x staging
                pltpu.VMEM((TB, H_P), jnp.bfloat16),   # l1 intermediate
            ],
        ),
        compiler_params=pltpu.CompilerParams(
            # Batch axis is embarrassingly parallel -> shards across v7x's 2 TCs.
            dimension_semantics=("parallel",),
            # ~13 MiB peak at TB=1024; raise the scoped limit so v5e's 16 MiB
            # default isn't a constraint (well under every gen's physical VMEM).
            vmem_limit_bytes=32 * 1024 * 1024,
        ),
        cost_estimate=pl.CostEstimate(
            flops=flops, transcendentals=0, bytes_accessed=bytes_accessed
        ),
    )(x, w1_p, b1_p, w2_p, b2_p)
    return out


def init_params(key):
    """Deterministic init mirroring nn.Linear default: U(-1/sqrt(fan_in), ...)."""
    k1, k2, k3, k4 = jax.random.split(key, 4)
    bound1 = 1.0 / (D_IN ** 0.5)
    bound2 = 1.0 / (D_HID ** 0.5)
    # Stored as (in, out) == W.T so the kernel does x @ W.T directly.
    w1 = jax.random.uniform(k1, (D_IN, D_HID), jnp.float32, -bound1, bound1)
    b1 = jax.random.uniform(k2, (D_HID,), jnp.float32, -bound1, bound1)
    w2 = jax.random.uniform(k3, (D_HID, D_OUT), jnp.float32, -bound2, bound2)
    b2 = jax.random.uniform(k4, (D_OUT,), jnp.float32, -bound2, bound2)
    return w1, b1, w2, b2


if __name__ == "__main__":
    key = jax.random.PRNGKey(0)
    kp, kx1, kx2 = jax.random.split(key, 3)

    w1, b1, w2, b2 = init_params(kp)
    params = prepare_params(w1, b1, w2, b2)   # one-time pad + bf16 cast

    # Small batch: single grid step with a partial (masked) batch block.
    B = 4
    x = jax.random.normal(kx1, (B, D_IN), jnp.float32)
    out = jax.block_until_ready(linear_expansion(x, *params))
    ref = (x @ w1 + b1) @ w2 + b2
    assert out.shape == (B, D_OUT)
    # Tolerance loosened vs the f32 reference because weights/l1 travel as bf16.
    assert jnp.allclose(out, ref, atol=2e-2, rtol=2e-2), "mismatch vs reference (B=4)"

    # Batch that exercises two grid steps + a partial trailing block (40 = 32 + 8).
    B2 = 40
    x2 = jax.random.normal(kx2, (B2, D_IN), jnp.float32)
    out2 = jax.block_until_ready(linear_expansion(x2, *params))
    ref2 = (x2 @ w1 + b1) @ w2 + b2
    assert out2.shape == (B2, D_OUT)
    assert jnp.allclose(out2, ref2, atol=2e-2, rtol=2e-2), "mismatch vs reference (B=40)"

    print("KERNEL_OK")
</pallas_src>

<mosaic_0001>
module attributes {stable_mosaic.version = 11 : i64} {
  func.func @linear_expansion_kernel(%arg0: i32, %arg1: memref<16x375xf32, #tpu.memory_space<vmem>>, %arg2: memref<384x512xbf16, #tpu.memory_space<vmem>>, %arg3: memref<1x512xf32, #tpu.memory_space<vmem>>, %arg4: memref<512x750xbf16, #tpu.memory_space<vmem>>, %arg5: memref<1x750xf32, #tpu.memory_space<vmem>>, %arg6: memref<16x750xf32, #tpu.memory_space<vmem>>, %arg7: memref<16x384xbf16, #tpu.memory_space<vmem>>, %arg8: memref<16x512xbf16, #tpu.memory_space<vmem>>) attributes {dimension_semantics = [#tpu.dimension_semantics<parallel>], iteration_bounds = array<i64: 1>, scalar_prefetch = 0 : i64, scratch_operands = 2 : i64, tpu.core_type = #tpu.core_type<tc>, window_params = [{transform_indices = @transform_0, window_bounds = array<i64: 16, 375>}, {pipeline_mode = #tpu.pipeline_mode<synchronous>, transform_indices = @transform_1, window_bounds = array<i64: 384, 512>}, {pipeline_mode = #tpu.pipeline_mode<synchronous>, transform_indices = @transform_2, window_bounds = array<i64: 1, 512>}, {pipeline_mode = #tpu.pipeline_mode<synchronous>, transform_indices = @transform_3, window_bounds = array<i64: 512, 750>}, {pipeline_mode = #tpu.pipeline_mode<synchronous>, transform_indices = @transform_4, window_bounds = array<i64: 1, 750>}, {transform_indices = @transform_5, window_bounds = array<i64: 16, 750>}]} {
    %cst = arith.constant 0.000000e+00 : bf16
    %0 = vector.broadcast %cst : bf16 to vector<16x384xbf16>
    %c0 = arith.constant 0 : index
    %c0_0 = arith.constant 0 : index
    %1 = vector.load %arg7[%c0, %c0_0] : memref<16x384xbf16, #tpu.memory_space<vmem>>, vector<16x384xbf16>
    tpu.vector_store %arg7[%c0, %c0_0], %0 {strides = array<i32>} : memref<16x384xbf16, #tpu.memory_space<vmem>>, vector<16x384xbf16>,
    %c0_1 = arith.constant 0 : index
    %c0_2 = arith.constant 0 : index
    %2 = vector.load %arg1[%c0_1, %c0_2] : memref<16x375xf32, #tpu.memory_space<vmem>>, vector<16x375xf32>
    %3 = arith.truncf %2 : vector<16x375xf32> to vector<16x375xbf16>
    %c0_3 = arith.constant 0 : index
    %c0_4 = arith.constant 0 : index
    %4 = vector.load %arg7[%c0_3, %c0_4] : memref<16x384xbf16, #tpu.memory_space<vmem>>, vector<16x375xbf16>
    tpu.vector_store %arg7[%c0_3, %c0_4], %3 {strides = array<i32>} : memref<16x384xbf16, #tpu.memory_space<vmem>>, vector<16x375xbf16>,
    %c0_5 = arith.constant 0 : index
    %c0_6 = arith.constant 0 : index
    %5 = vector.load %arg7[%c0_5, %c0_6] : memref<16x384xbf16, #tpu.memory_space<vmem>>, vector<16x384xbf16>
    %c0_7 = arith.constant 0 : index
    %c0_8 = arith.constant 0 : index
    %6 = vector.load %arg2[%c0_7, %c0_8] : memref<384x512xbf16, #tpu.memory_space<vmem>>, vector<384x512xbf16>
    %cst_9 = arith.constant dense<0.000000e+00> : vector<16x512xf32>
    %7 = tpu.matmul %5, %6, %cst_9 {dimension_numbers = #tpu.dot_dimension_numbers<[1], [0], [0], [1], [0, 0, 1, 1], [], []>} : vector<16x384xbf16>, vector<384x512xbf16>, vector<16x512xf32> -> vector<16x512xf32>
    %c0_10 = arith.constant 0 : index
    %c0_11 = arith.constant 0 : index
    %8 = vector.load %arg3[%c0_10, %c0_11] : memref<1x512xf32, #tpu.memory_space<vmem>>, vector<1x512xf32>
    %9 = vector.broadcast %8 : vector<1x512xf32> to vector<16x512xf32>
    %10 = arith.addf %7, %9 : vector<16x512xf32>
    %11 = arith.truncf %10 : vector<16x512xf32> to vector<16x512xbf16>
    %c0_12 = arith.constant 0 : index
    %c0_13 = arith.constant 0 : index
    %12 = vector.load %arg8[%c0_12, %c0_13] : memref<16x512xbf16, #tpu.memory_space<vmem>>, vector<16x512xbf16>
    tpu.vector_store %arg8[%c0_12, %c0_13], %11 {strides = array<i32>} : memref<16x512xbf16, #tpu.memory_space<vmem>>, vector<16x512xbf16>,
    %c0_14 = arith.constant 0 : index
    %c0_15 = arith.constant 0 : index
    %13 = vector.load %arg8[%c0_14, %c0_15] : memref<16x512xbf16, #tpu.memory_space<vmem>>, vector<16x512xbf16>
    %c0_16 = arith.constant 0 : index
    %c0_17 = arith.constant 0 : index
    %14 = vector.load %arg4[%c0_16, %c0_17] : memref<512x750xbf16, #tpu.memory_space<vmem>>, vector<512x750xbf16>
    %cst_18 = arith.constant dense<0.000000e+00> : vector<16x750xf32>
    %15 = tpu.matmul %13, %14, %cst_18 {dimension_numbers = #tpu.dot_dimension_numbers<[1], [0], [0], [1], [0, 0, 1, 1], [], []>} : vector<16x512xbf16>, vector<512x750xbf16>, vector<16x750xf32> -> vector<16x750xf32>
    %c0_19 = arith.constant 0 : index
    %c0_20 = arith.constant 0 : index
    %16 = vector.load %arg5[%c0_19, %c0_20] : memref<1x750xf32, #tpu.memory_space<vmem>>, vector<1x750xf32>
    %17 = vector.broadcast %16 : vector<1x750xf32> to vector<16x750xf32>
    %18 = arith.addf %15, %17 : vector<16x750xf32>
    %c0_21 = arith.constant 0 : index
    %c0_22 = arith.constant 0 : index
    %19 = vector.load %arg6[%c0_21, %c0_22] : memref<16x750xf32, #tpu.memory_space<vmem>>, vector<16x750xf32>
    tpu.vector_store %arg6[%c0_21, %c0_22], %18 {strides = array<i32>} : memref<16x750xf32, #tpu.memory_space<vmem>>, vector<16x750xf32>,
    return
  }
  func.func @transform_0(%arg0: i32) -> (i32, i32) {
    %c0_i32 = arith.constant 0 : i32
    %c0_i32_0 = arith.constant 0 : i32
    return %arg0, %c0_i32 : i32, i32
  }
  func.func @transform_1(%arg0: i32) -> (i32, i32) {
    %c0_i32 = arith.constant 0 : i32
    %c0_i32_0 = arith.constant 0 : i32
    %c0_i32_1 = arith.constant 0 : i32
    return %c0_i32, %c0_i32_0 : i32, i32
  }
  func.func @transform_2(%arg0: i32) -> (i32, i32) {
    %c0_i32 = arith.constant 0 : i32
    %c0_i32_0 = arith.constant 0 : i32
    %c0_i32_1 = arith.constant 0 : i32
    return %c0_i32, %c0_i32_0 : i32, i32
  }
  func.func @transform_3(%arg0: i32) -> (i32, i32) {
    %c0_i32 = arith.constant 0 : i32
    %c0_i32_0 = arith.constant 0 : i32
    %c0_i32_1 = arith.constant 0 : i32
    return %c0_i32, %c0_i32_0 : i32, i32
  }
  func.func @transform_4(%arg0: i32) -> (i32, i32) {
    %c0_i32 = arith.constant 0 : i32
    %c0_i32_0 = arith.constant 0 : i32
    %c0_i32_1 = arith.constant 0 : i32
    return %c0_i32, %c0_i32_0 : i32, i32
  }
  func.func @transform_5(%arg0: i32) -> (i32, i32) {
    %c0_i32 = arith.constant 0 : i32
    %c0_i32_0 = arith.constant 0 : i32
    return %arg0, %c0_i32 : i32, i32
  }
}

</mosaic_0001>

<bundles_post_ra>
// kernel: linear_expansion.1
= control target key start
LH: loop header
LB: loop body
LE: loop exit
PB: predicated region body
PF: predicated region fallthrough
CT: control target
= control target key end

     0   :  { %10 = vsyncpa [#allocation5], 0  ;;  %v3150_v2 = vmov 0   ;;  %vm58_vm0 = vcmask 973824   ;;  %vm2325_vm1 = vcmask 1043456   ;;  %vm2326_vm2 = vcmask 900100   ;;  %s4145_s0 = inlined_call_operand.vmem [shape: f32[4,375], index: 0, kind: input, shape index: {}]   ;;  %s4146_s1 = inlined_call_operand.vmem [shape: bf16[384,512], index: 1, kind: input, shape index: {}]   ;;  %s4147_s2 = inlined_call_operand.vmem [shape: f32[1,512], index: 2, kind: input, shape index: {}]   ;;  %s4148_s3 = inlined_call_operand.vmem [shape: bf16[512,750], index: 3, kind: input, shape index: {}]   ;;  %s4149_s4 = inlined_call_operand.vmem [shape: f32[1,750], index: 4, kind: input, shape index: {}]   ;;  %s4150_s5 = inlined_call_operand.hbm [shape: f32[4,750], index: 5, kind: output, shape index: {}]  }
   0x1   :  { %v2686_v0 = vld [vmem:[%s4146_s1 + $0x4] ss:$16 sps:$4 sm:$0xff]   ;;  %v2688_v1 = vld [vmem:[%s4146_s1] ss:$16 sps:$4 sm:$0xff]   ;;  %24 = vst [vmem:[#allocation2 + $0x10] sm:$0xff] %v3150_v2  ;;  %736 = vmatprep.mubr.bf16.mxu0 %v3150_v2  ;;  %vm2327_vm3 = vmor %vm2326_vm2, %vm2325_vm1 }
   0x2   :  { %v2689_v3 = vld [vmem:[%s4146_s1 + $0x24] ss:$16 sps:$4 sm:$0xff]   ;;  %661 = vmatprep.subr.bf16.mxu1 %v2686_v0  ;;  %v2691_v4 = vld [vmem:[%s4146_s1 + $0x20] ss:$16 sps:$4 sm:$0xff]   ;;  %v2759_v34 = vld [vmem:[%s4145_s0 + $0x1c] ss:$12 sps:$4 sm:$0xff]  }
   0x3   :  { %662 = vmatpush1.bf16.msra.mxu1 %v2688_v1  ;;  %v2692_v5 = vld [vmem:[%s4146_s1 + $0x44] ss:$16 sps:$4 sm:$0xff]   ;;  %v2694_v6 = vld [vmem:[%s4146_s1 + $0x40] ss:$16 sps:$4 sm:$0xff]   ;;  %v2766_v59 = vld [vmem:[%s4146_s1 + $0xc] ss:$16 sps:$4 sm:$0xff]  }
   0x4   :  { %663 = vmatprep.subr.bf16.mxu1 %v2689_v3  ;;  %v2695_v7 = vld [vmem:[%s4146_s1 + $0x64] ss:$16 sps:$4 sm:$0xff]   ;;  %v2697_v8 = vld [vmem:[%s4146_s1 + $0x60] ss:$16 sps:$4 sm:$0xff]   ;;  %v2764_v60 = vld [vmem:[%s4146_s1 + $0x8] ss:$16 sps:$4 sm:$0xff]  }
   0x5   :  { %v2698_v9 = vld [vmem:[%s4146_s1 + $0x84] ss:$16 sps:$4 sm:$0xff]   ;;  %v2715_v11 = vld [vmem:[%s4146_s1 + $0x200] ss:$16 sps:$4 sm:$0xff]   ;;  %v2771_v61 = vld [vmem:[%s4146_s1 + $0x2c] ss:$16 sps:$4 sm:$0xff]  }
   0x6   :  { %v2713_v10 = vld [vmem:[%s4146_s1 + $0x204] ss:$16 sps:$4 sm:$0xff]   ;;  %v2700_v12 = vld [vmem:[%s4146_s1 + $0x80] ss:$16 sps:$4 sm:$0xff]   ;;  %v2769_v62 = vld [vmem:[%s4146_s1 + $0x28] ss:$16 sps:$4 sm:$0xff]  }
   0x7   :  { %664 = vmatpush1.bf16.msra.mxu1 %v2691_v4  ;;  %704 = vmatprep.subr.bf16.mxu0 %v2713_v10  ;;  %v2719_v13 = vld [vmem:[%s4146_s1 + $0x224] ss:$16 sps:$4 sm:$0xff]   ;;  %v2721_v14 = vld [vmem:[%s4146_s1 + $0x220] ss:$16 sps:$4 sm:$0xff]   ;;  %v2774_v63 = vld [vmem:[%s4146_s1 + $0x4c] ss:$16 sps:$4 sm:$0xff]  }
   0x8   :  { %665 = vmatprep.subr.bf16.mxu1 %v2692_v5  ;;  %705 = vmatpush1.bf16.msra.mxu0 %v2715_v11  ;;  %v2701_v15 = vld [vmem:[%s4146_s1 + $0xa4] ss:$16 sps:$4 sm:$0xff]   ;;  %v2703_v17 = vld [vmem:[%s4146_s1 + $0xa0] ss:$16 sps:$4 sm:$0xff]   ;;  %v2772_v3 = vld [vmem:[%s4146_s1 + $0x48] ss:$16 sps:$4 sm:$0xff]  }
   0x9   :  { %706 = vmatprep.subr.bf16.mxu0 %v2719_v13  ;;  %v2725_v16 = vld [vmem:[%s4146_s1 + $0x244] ss:$16 sps:$4 sm:$0xff]   ;;  %v2727_v18 = vld [vmem:[%s4146_s1 + $0x240] ss:$16 sps:$4 sm:$0xff]   ;;  %v2777_v4 = vld [vmem:[%s4146_s1 + $0x6c] ss:$16 sps:$4 sm:$0xff]  }
   0xa   :  { %v2704_v19 = vld [vmem:[%s4146_s1 + $0xc4] ss:$16 sps:$4 sm:$0xff]   ;;  %v2706_v21 = vld [vmem:[%s4146_s1 + $0xc0] ss:$16 sps:$4 sm:$0xff]   ;;  %v2783_v13 = vld [vmem:[%s4146_s1 + $0xac] ss:$16 sps:$4 sm:$0xff]  }
   0xb   :  { %666 = vmatpush1.bf16.msra.mxu1 %v2694_v6  ;;  %v2731_v20 = vld [vmem:[%s4146_s1 + $0x264] ss:$16 sps:$4 sm:$0xff]   ;;  %v2733_v22 = vld [vmem:[%s4146_s1 + $0x260] ss:$16 sps:$4 sm:$0xff]  }
   0xc   :  { %667 = vmatprep.subr.bf16.mxu1 %v2695_v7  ;;  %707 = vmatpush1.bf16.msra.mxu0 %v2721_v14  ;;  %v2707_v23 = vld [vmem:[%s4146_s1 + $0xe4] ss:$16 sps:$4 sm:$0xff]   ;;  %v2709_v25 = vld [vmem:[%s4146_s1 + $0xe0] ss:$16 sps:$4 sm:$0xff]   ;;  %v2775_v7 = vld [vmem:[%s4146_s1 + $0x68] ss:$16 sps:$4 sm:$0xff]  }
   0xd   :  { %708 = vmatprep.subr.bf16.mxu0 %v2725_v16  ;;  %v2737_v24 = vld [vmem:[%s4146_s1 + $0x284] ss:$16 sps:$4 sm:$0xff]   ;;  %v2739_v26 = vld [vmem:[%s4146_s1 + $0x280] ss:$16 sps:$4 sm:$0xff]   ;;  %v2781_v16 = vld [vmem:[%s4146_s1 + $0xa8] ss:$16 sps:$4 sm:$0xff]  }
   0xe   :  { %v2710_v27 = vld [vmem:[%s4146_s1 + $0x104] ss:$16 sps:$4 sm:$0xff]   ;;  %v2712_v29 = vld [vmem:[%s4146_s1 + $0x100] ss:$16 sps:$4 sm:$0xff]  }
   0xf   :  { %668 = vmatpush1.bf16.msra.mxu1 %v2697_v8  ;;  %v2743_v28 = vld [vmem:[%s4146_s1 + $0x2a4] ss:$16 sps:$4 sm:$0xff]   ;;  %v2745_v30 = vld [vmem:[%s4146_s1 + $0x2a0] ss:$16 sps:$4 sm:$0xff]  }
  0x10   :  { %669 = vmatprep.subr.bf16.mxu1 %v2698_v9  ;;  %709 = vmatpush1.bf16.msra.mxu0 %v2727_v18  ;;  %v2716_v31 = vld [vmem:[%s4146_s1 + $0x124] ss:$16 sps:$4 sm:$0xff]   ;;  %v2718_v35 = vld [vmem:[%s4146_s1 + $0x120] ss:$16 sps:$4 sm:$0xff]   ;;  %v2780_v9 = vld [vmem:[%s4146_s1 + $0x8c] ss:$16 sps:$4 sm:$0xff]  }
  0x11   :  { %710 = vmatprep.subr.bf16.mxu0 %v2731_v20  ;;  %v2749_v32 = vld [vmem:[%s4146_s1 + $0x2c4] ss:$16 sps:$4 sm:$0xff]   ;;  %v2762_v36 = vld [vmem:[%s4145_s0] ss:$12 sps:$4 sm:$0xff]   ;;  %v2844_v5 = vld [vmem:[%s4148_s3 + $0x30] ss:$24 sps:$4 sm:$0xff]  }
  0x12   :  { %v2757_v33 = vld [vmem:[%s4145_s0 + $0x4] ss:$12 sps:$4 sm:$0xff]   ;;  %v2767_v43 = vld [vmem:[%s4145_s0 + $0x8] ss:$12 sps:$4 sm:$0xff]   ;;  %v2768_v44 = vld [vmem:[%s4145_s0 + $0x20] ss:$12 sps:$4 sm:$0xff]  }
  0x13   :  { %670 = vmatpush1.bf16.msra.mxu1 %v2700_v12  ;;  %v2763_v37 = vld [vmem:[%s4145_s0 + $0x18] ss:$12 sps:$4 sm:$0xff]   ;;  %v2751_v39 = vld [vmem:[%s4146_s1 + $0x2c0] ss:$16 sps:$4 sm:$0xff]   ;;  %v54_v40 = vpack.c.bf16 %v2759_v34, %v2757_v33  ;;  %v55_v47 = vpack.c.bf16 %v2768_v44, %v2767_v43  ;;  %v2846_v6 = vld [vmem:[%s4148_s3 + $0x34] ss:$24 sps:$4 sm:$0xff]  }
  0x14   :  { %671 = vmatprep.subr.bf16.mxu1 %v2701_v15  ;;  %711 = vmatpush1.bf16.msra.mxu0 %v2733_v22  ;;  %v2722_v38 = vld [vmem:[%s4146_s1 + $0x144] ss:$16 sps:$4 sm:$0xff]   ;;  %v3306_v42 = vpack.c.bf16 %v2763_v37, %v2762_v36  ;;  %v2724_v45 = vld [vmem:[%s4146_s1 + $0x140] ss:$16 sps:$4 sm:$0xff]   ;;  %v2778_v12 = vld [vmem:[%s4146_s1 + $0x88] ss:$16 sps:$4 sm:$0xff]  }
  0x15   :  { %712 = vmatprep.subr.bf16.mxu0 %v2737_v24  ;;  %v2755_v41 = vld [vmem:[%s4146_s1 + $0x2e4] ss:$16 sps:$4 sm:$0xff]   ;;  %693 = vmatprep.mubr.bf16.mxu1 %v54_v40  ;;  %v2761_v46 = vld [vmem:[%s4146_s1 + $0x2e0] ss:$16 sps:$4 sm:$0xff]   ;;  %59 = vst.msk [vmem:[#allocation2 + $0x10] sm:$0xff] %vm58_vm0, %v55_v47 }
  0x16   :  { %v2728_v48 = vld [vmem:[%s4146_s1 + $0x164] ss:$16 sps:$4 sm:$0xff]   ;;  %v2730_v49 = vld [vmem:[%s4146_s1 + $0x160] ss:$16 sps:$4 sm:$0xff]   ;;  %v2784_v20 = vld [vmem:[%s4146_s1 + $0xc8] ss:$16 sps:$4 sm:$0xff]  }
  0x17   :  { %672 = vmatpush1.bf16.msra.mxu1 %v2703_v17  ;;  %v2734_v50 = vld [vmem:[%s4146_s1 + $0x184] ss:$16 sps:$4 sm:$0xff]   ;;  %v2736_v51 = vld [vmem:[%s4146_s1 + $0x180] ss:$16 sps:$4 sm:$0xff]   ;;  %v2786_v17 = vld [vmem:[%s4146_s1 + $0xcc] ss:$16 sps:$4 sm:$0xff]  }
  0x18   :  { %673 = vmatprep.subr.bf16.mxu1 %v2704_v19  ;;  %713 = vmatpush1.bf16.msra.mxu0 %v2739_v26  ;;  %v2740_v52 = vld [vmem:[%s4146_s1 + $0x1a4] ss:$16 sps:$4 sm:$0xff]   ;;  %v2742_v54 = vld [vmem:[%s4146_s1 + $0x1a0] ss:$16 sps:$4 sm:$0xff]   ;;  %v2787_v24 = vld [vmem:[%s4146_s1 + $0xe8] ss:$16 sps:$4 sm:$0xff]  }
  0x19   :  { %714 = vmatprep.subr.bf16.mxu0 %v2743_v28  ;;  %v2746_v55 = vld [vmem:[%s4146_s1 + $0x1c4] ss:$16 sps:$4 sm:$0xff]   ;;  %v2748_v56 = vld [vmem:[%s4146_s1 + $0x1c0] ss:$16 sps:$4 sm:$0xff]   ;;  %v2790_v28 = vld [vmem:[%s4146_s1 + $0x108] ss:$16 sps:$4 sm:$0xff]  }
  0x1a   :  { %v2752_v57 = vld [vmem:[%s4146_s1 + $0x1e4] ss:$16 sps:$4 sm:$0xff]   ;;  %v2754_v58 = vld [vmem:[%s4146_s1 + $0x1e0] ss:$16 sps:$4 sm:$0xff]   ;;  %v2798_v33 = vld [vmem:[%s4146_s1 + $0x14c] ss:$16 sps:$4 sm:$0xff]  }
  0x1b   :  { %674 = vmatpush1.bf16.msra.mxu1 %v2706_v21  ;;  %v2838_v0 = vld [vmem:[%s4148_s3] ss:$24 sps:$4 sm:$0xff]   ;;  %v2840_v1 = vld [vmem:[%s4148_s3 + $0x4] ss:$24 sps:$4 sm:$0xff]   ;;  %v2858_v11 = vld [vmem:[%s4148_s3 + $0x94] ss:$24 sps:$4 sm:$0xff]  }
  0x1c   :  { %675 = vmatprep.subr.bf16.mxu1 %v2707_v23  ;;  %715 = vmatpush1.bf16.msra.mxu0 %v2745_v30  ;;  %v3335_v53 = vld [vmem:[#allocation2 + $0x10] sm:$0xff]  ;;  %v2852_v8 = vld [vmem:[%s4148_s3 + $0x64] ss:$24 sps:$4 sm:$0xff]   ;;  %v2850_v10 = vld [vmem:[%s4148_s3 + $0x60] ss:$24 sps:$4 sm:$0xff]  }
  0x1d   :  { %716 = vmatprep.subr.bf16.mxu0 %v2749_v32  ;;  %v2856_v14 = vld [vmem:[%s4148_s3 + $0x90] ss:$24 sps:$4 sm:$0xff]   ;;  %v2864_v15 = vld [vmem:[%s4148_s3 + $0xc4] ss:$24 sps:$4 sm:$0xff]   ;;  %v2862_v18 = vld [vmem:[%s4148_s3 + $0xc0] ss:$24 sps:$4 sm:$0xff]  }
  0x1e   :  { %v2870_v19 = vld [vmem:[%s4148_s3 + $0xf4] ss:$24 sps:$4 sm:$0xff]   ;;  %v2868_v22 = vld [vmem:[%s4148_s3 + $0xf0] ss:$24 sps:$4 sm:$0xff]   ;;  %v2876_v23 = vld [vmem:[%s4148_s3 + $0x124] ss:$24 sps:$4 sm:$0xff]  }
  0x1f   :  { %676 = vmatpush1.bf16.msra.mxu1 %v2709_v25  ;;  %v2789_v21 = vld [vmem:[%s4146_s1 + $0xec] ss:$16 sps:$4 sm:$0xff]   ;;  %v2874_v26 = vld [vmem:[%s4148_s3 + $0x120] ss:$24 sps:$4 sm:$0xff]   ;;  %v2880_v30 = vld [vmem:[%s4148_s3 + $0x150] ss:$24 sps:$4 sm:$0xff]  }
  0x20   :  { %677 = vmatprep.subr.bf16.mxu1 %v2710_v27  ;;  %717 = vmatpush1.bf16.msra.mxu0 %v2751_v39  ;;  %v2792_v25 = vld [vmem:[%s4146_s1 + $0x10c] ss:$16 sps:$4 sm:$0xff]   ;;  %v2793_v32 = vld [vmem:[%s4146_s1 + $0x128] ss:$16 sps:$4 sm:$0xff]  }
  0x21   :  { %718 = vmatprep.subr.bf16.mxu0 %v2755_v41  ;;  %v2882_v27 = vld [vmem:[%s4148_s3 + $0x154] ss:$24 sps:$4 sm:$0xff]   ;;  %v2886_v34 = vld [vmem:[%s4148_s3 + $0x180] ss:$24 sps:$4 sm:$0xff]   ;;  %v2904_v47 = vld [vmem:[%s4148_s3 + $0x210] ss:$24 sps:$4 sm:$0xff]  }
  0x22   :  { %v2796_v36 = vld [vmem:[%s4146_s1 + $0x148] ss:$16 sps:$4 sm:$0xff]   ;;  %v2801_v37 = vld [vmem:[%s4146_s1 + $0x16c] ss:$16 sps:$4 sm:$0xff]  }
  0x23   :  { %678 = vmatpush1.bf16.msra.mxu1 %v2712_v29  ;;  %v2795_v29 = vld [vmem:[%s4146_s1 + $0x12c] ss:$16 sps:$4 sm:$0xff]   ;;  %v2799_v39 = vld [vmem:[%s4146_s1 + $0x168] ss:$16 sps:$4 sm:$0xff]  }
  0x24   :  { %679 = vmatprep.subr.bf16.mxu1 %v2716_v31  ;;  %719 = vmatpush1.bf16.msra.mxu0 %v2761_v46  ;;  %v2888_v31 = vld [vmem:[%s4148_s3 + $0x184] ss:$24 sps:$4 sm:$0xff]   ;;  %v2898_v43 = vld [vmem:[%s4148_s3 + $0x1e0] ss:$24 sps:$4 sm:$0xff]   ;;  %v2906_v44 = vld [vmem:[%s4148_s3 + $0x214] ss:$24 sps:$4 sm:$0xff]  }
  0x25   :  { %2029 = vmatprep.subr.bf16.mxu0 %v2840_v1  ;;  %v2804_v41 = vld [vmem:[%s4146_s1 + $0x18c] ss:$16 sps:$4 sm:$0xff]  }
  0x26   :  { %v2807_v46 = vld [vmem:[%s4146_s1 + $0x1ac] ss:$16 sps:$4 sm:$0xff]  }
  0x27   :  { %680 = vmatpush1.bf16.msra.mxu1 %v2718_v35  ;;  %737 = vmatmul.mubr.bf16.vlgmr.msra.gmra.mrb[0].mxu0 %v3335_v53  ;;  %v2894_v35 = vld [vmem:[%s4148_s3 + $0x1b4] ss:$24 sps:$4 sm:$0xff]  }
  0x28   :  { %681 = vmatprep.subr.bf16.mxu1 %v2722_v38  ;;  %2030 = vmatpush1.bf16.msra.mxu0 %v2838_v0  ;;  %v2892_v38 = vld [vmem:[%s4148_s3 + $0x1b0] ss:$24 sps:$4 sm:$0xff]   ;;  %v2825_v0 = vld [vmem:[%s4146_s1 + $0x26c] ss:$16 sps:$4 sm:$0xff]  }
  0x29   :  { %2031 = vmatprep.subr.bf16.mxu0 %v2846_v6  ;;  %v2828_v1 = vld [vmem:[%s4146_s1 + $0x28c] ss:$16 sps:$4 sm:$0xff]  }
  0x2a   :  { %v2924_v6 = vld [vmem:[%s4148_s3 + $0x2a4] ss:$24 sps:$4 sm:$0xff]  }
  0x2b   :  { %682 = vmatpush1.bf16.msra.mxu1 %v2724_v45  ;;  %v2802_v45 = vld [vmem:[%s4146_s1 + $0x188] ss:$16 sps:$4 sm:$0xff]  }
  0x2c   :  { %683 = vmatprep.subr.bf16.mxu1 %v2728_v48  ;;  %2032 = vmatpush1.bf16.msra.mxu0 %v2844_v5  ;;  %v2912_v48 = vld [vmem:[%s4148_s3 + $0x244] ss:$24 sps:$4 sm:$0xff]  }
  0x2d   :  { %2033 = vmatprep.subr.bf16.mxu0 %v2852_v8  ;;  %v2834_v5 = vld [vmem:[%s4146_s1 + $0x2cc] ss:$16 sps:$4 sm:$0xff]   ;;  %v2922_v8 = vld [vmem:[%s4148_s3 + $0x2a0] ss:$24 sps:$4 sm:$0xff]  }
  0x2f   :  { %684 = vmatpush1.bf16.msra.mxu1 %v2730_v49  ;;  %v2805_v49 = vld [vmem:[%s4146_s1 + $0x1a8] ss:$16 sps:$4 sm:$0xff]  }
  0x30   :  { %685 = vmatprep.subr.bf16.mxu1 %v2734_v50  ;;  %2034 = vmatpush1.bf16.msra.mxu0 %v2850_v10  ;;  %v2810_v50 = vld [vmem:[%s4146_s1 + $0x1cc] ss:$16 sps:$4 sm:$0xff]  }
  0x31   :  { %2035 = vmatprep.subr.bf16.mxu0 %v2858_v11  ;;  %v2930_v10 = vld [vmem:[%s4148_s3 + $0x2d4] ss:$24 sps:$4 sm:$0xff]   ;;  %v2835_v11 = vld [vmem:[%s4146_s1 + $0x2e8] ss:$16 sps:$4 sm:$0xff]  }
  0x33   :  { %686 = vmatpush1.bf16.msra.mxu1 %v2736_v51  ;;  %v2910_v51 = vld [vmem:[%s4148_s3 + $0x240] ss:$24 sps:$4 sm:$0xff]  }
  0x34   :  { %687 = vmatprep.subr.bf16.mxu1 %v2740_v52  ;;  %2036 = vmatpush1.bf16.msra.mxu0 %v2856_v14  ;;  %v2918_v52 = vld [vmem:[%s4148_s3 + $0x274] ss:$24 sps:$4 sm:$0xff]   ;;  %v2841_v14 = vld [vmem:[%s4148_s3 + $0x8] ss:$24 sps:$4 sm:$0xff]  }
  0x35   :  { %2037 = vmatprep.subr.bf16.mxu0 %v2864_v15  ;;  %v2849_v15 = vld [vmem:[%s4148_s3 + $0x3c] ss:$24 sps:$4 sm:$0xff]  }
  0x37   :  { %688 = vmatpush1.bf16.msra.mxu1 %v2742_v54  ;;  %v2808_v54 = vld [vmem:[%s4146_s1 + $0x1c8] ss:$16 sps:$4 sm:$0xff]  }
  0x38   :  { %689 = vmatprep.subr.bf16.mxu1 %v2746_v55  ;;  %2038 = vmatpush1.bf16.msra.mxu0 %v2862_v18  ;;  %v2813_v55 = vld [vmem:[%s4146_s1 + $0x1ec] ss:$16 sps:$4 sm:$0xff]  }
  0x39   :  { %2039 = vmatprep.subr.bf16.mxu0 %v2870_v19  ;;  %v2855_v18 = vld [vmem:[%s4148_s3 + $0x6c] ss:$24 sps:$4 sm:$0xff]   ;;  %v2853_v19 = vld [vmem:[%s4148_s3 + $0x68] ss:$24 sps:$4 sm:$0xff]  }
  0x3b   :  { %690 = vmatpush1.bf16.msra.mxu1 %v2748_v56  ;;  %v2916_v56 = vld [vmem:[%s4148_s3 + $0x270] ss:$24 sps:$4 sm:$0xff]  }
  0x3c   :  { %691 = vmatprep.subr.bf16.mxu1 %v2752_v57  ;;  %2040 = vmatpush1.bf16.msra.mxu0 %v2868_v22  ;;  %v2811_v57 = vld [vmem:[%s4146_s1 + $0x1e8] ss:$16 sps:$4 sm:$0xff]  }
  0x3d   :  { %2041 = vmatprep.subr.bf16.mxu0 %v2876_v23  ;;  %v2865_v22 = vld [vmem:[%s4148_s3 + $0xc8] ss:$24 sps:$4 sm:$0xff]   ;;  %v2873_v23 = vld [vmem:[%s4148_s3 + $0xfc] ss:$24 sps:$4 sm:$0xff]  }
  0x3f   :  { %692 = vmatpush1.bf16.msra.mxu1 %v2754_v58  ;;  %v2816_v58 = vld [vmem:[%s4146_s1 + $0x20c] ss:$16 sps:$4 sm:$0xff]  }
  0x40   :  { %747 = vmatprep.subr.bf16.mxu1 %v2766_v59  ;;  %2042 = vmatpush1.bf16.msra.mxu0 %v2874_v26  ;;  %v2814_v59 = vld [vmem:[%s4146_s1 + $0x208] ss:$16 sps:$4 sm:$0xff]  }
  0x41   :  { %2043 = vmatprep.subr.bf16.mxu0 %v2882_v27  ;;  %v2877_v26 = vld [vmem:[%s4148_s3 + $0x128] ss:$24 sps:$4 sm:$0xff]   ;;  %v2885_v27 = vld [vmem:[%s4148_s3 + $0x15c] ss:$24 sps:$4 sm:$0xff]  }
  0x42   :  { %694 = vmatmul.mubr.bf16.vlgmr.msra.gmra.mrb[0].mxu1 %v3306_v42 }
  0x43   :  { %748 = vmatpush1.bf16.msra.mxu1 %v2764_v60  ;;  %779 = vmatprep.mubr.bf16.mxu1 %v54_v40  ;;  %v2900_v40 = vld [vmem:[%s4148_s3 + $0x1e4] ss:$24 sps:$4 sm:$0xff]  }
  0x44   :  { %749 = vmatprep.subr.bf16.mxu1 %v2771_v61  ;;  %2044 = vmatpush1.bf16.msra.mxu0 %v2880_v30  ;;  %v2819_v60 = vld [vmem:[%s4146_s1 + $0x22c] ss:$16 sps:$4 sm:$0xff]   ;;  %v2817_v61 = vld [vmem:[%s4146_s1 + $0x228] ss:$16 sps:$4 sm:$0xff]  }
  0x45   :  { %2045 = vmatprep.subr.bf16.mxu0 %v2888_v31  ;;  %v2889_v30 = vld [vmem:[%s4148_s3 + $0x188] ss:$24 sps:$4 sm:$0xff]   ;;  %v2897_v31 = vld [vmem:[%s4148_s3 + $0x1bc] ss:$24 sps:$4 sm:$0xff]  }
  0x47   :  { %750 = vmatpush1.bf16.msra.mxu1 %v2769_v62  ;;  %v2822_v62 = vld [vmem:[%s4146_s1 + $0x24c] ss:$16 sps:$4 sm:$0xff]  }
  0x48   :  { %751 = vmatprep.subr.bf16.mxu1 %v2774_v63  ;;  %2046 = vmatpush1.bf16.msra.mxu0 %v2886_v34  ;;  %v2820_v63 = vld [vmem:[%s4146_s1 + $0x248] ss:$16 sps:$4 sm:$0xff]  }
  0x49   :  { %2047 = vmatprep.subr.bf16.mxu0 %v2894_v35  ;;  %v2901_v34 = vld [vmem:[%s4148_s3 + $0x1e8] ss:$24 sps:$4 sm:$0xff]   ;;  %v2909_v35 = vld [vmem:[%s4148_s3 + $0x21c] ss:$24 sps:$4 sm:$0xff]  }
  0x4b   :  { %752 = vmatpush1.bf16.msra.mxu1 %v2772_v3  ;;  %v2831_v3 = vld [vmem:[%s4146_s1 + $0x2ac] ss:$16 sps:$4 sm:$0xff]  }
  0x4c   :  { %753 = vmatprep.subr.bf16.mxu1 %v2777_v4  ;;  %2048 = vmatpush1.bf16.msra.mxu0 %v2892_v38  ;;  %v2829_v4 = vld [vmem:[%s4146_s1 + $0x2a8] ss:$16 sps:$4 sm:$0xff]  }
  0x4d   :  { %2049 = vmatprep.subr.bf16.mxu0 %v2900_v40  ;;  %v2913_v38 = vld [vmem:[%s4148_s3 + $0x248] ss:$24 sps:$4 sm:$0xff]   ;;  %v2919_v40 = vld [vmem:[%s4148_s3 + $0x278] ss:$24 sps:$4 sm:$0xff]  }
  0x4f   :  { %754 = vmatpush1.bf16.msra.mxu1 %v2775_v7  ;;  %v2832_v7 = vld [vmem:[%s4146_s1 + $0x2c8] ss:$16 sps:$4 sm:$0xff]  }
  0x50   :  { %755 = vmatprep.subr.bf16.mxu1 %v2780_v9  ;;  %2050 = vmatpush1.bf16.msra.mxu0 %v2898_v43  ;;  %v2837_v9 = vld [vmem:[%s4146_s1 + $0x2ec] ss:$16 sps:$4 sm:$0xff]   ;;  %v2925_v43 = vld [vmem:[%s4148_s3 + $0x2a8] ss:$24 sps:$4 sm:$0xff]  }
  0x51   :  { %2051 = vmatprep.subr.bf16.mxu0 %v2906_v44  ;;  %v2933_v44 = vld [vmem:[%s4148_s3 + $0x2dc] ss:$24 sps:$4 sm:$0xff]  }
  0x53   :  { %756 = vmatpush1.bf16.msra.mxu1 %v2778_v12  ;;  %v2928_v12 = vld [vmem:[%s4148_s3 + $0x2d0] ss:$24 sps:$4 sm:$0xff]  }
  0x54   :  { %757 = vmatprep.subr.bf16.mxu1 %v2783_v13  ;;  %2052 = vmatpush1.bf16.msra.mxu0 %v2904_v47  ;;  %v2843_v13 = vld [vmem:[%s4148_s3 + $0xc] ss:$24 sps:$4 sm:$0xff]  }
  0x55   :  { %2053 = vmatprep.subr.bf16.mxu0 %v2912_v48 }
  0x57   :  { %758 = vmatpush1.bf16.msra.mxu1 %v2781_v16  ;;  %v2936_v16 = vld [vmem:[%s4148_s3 + $0x304] ss:$24 sps:$4 sm:$0xff]  }
  0x58   :  { %759 = vmatprep.subr.bf16.mxu1 %v2786_v17  ;;  %2054 = vmatpush1.bf16.msra.mxu0 %v2910_v51  ;;  %v2847_v17 = vld [vmem:[%s4148_s3 + $0x38] ss:$24 sps:$4 sm:$0xff]  }
  0x59   :  { %2055 = vmatprep.subr.bf16.mxu0 %v2918_v52 }
  0x5b   :  { %760 = vmatpush1.bf16.msra.mxu1 %v2784_v20  ;;  %v2859_v20 = vld [vmem:[%s4148_s3 + $0x98] ss:$24 sps:$4 sm:$0xff]  }
  0x5c   :  { %761 = vmatprep.subr.bf16.mxu1 %v2789_v21  ;;  %2056 = vmatpush1.bf16.msra.mxu0 %v2916_v56  ;;  %v2867_v21 = vld [vmem:[%s4148_s3 + $0xcc] ss:$24 sps:$4 sm:$0xff]  }
  0x5d   :  { %2057 = vmatprep.subr.bf16.mxu0 %v2924_v6 }
  0x5f   :  { %762 = vmatpush1.bf16.msra.mxu1 %v2787_v24  ;;  %v2871_v24 = vld [vmem:[%s4148_s3 + $0xf8] ss:$24 sps:$4 sm:$0xff]  }
  0x60   :  { %763 = vmatprep.subr.bf16.mxu1 %v2792_v25  ;;  %2058 = vmatpush1.bf16.msra.mxu0 %v2922_v8  ;;  %v2879_v25 = vld [vmem:[%s4148_s3 + $0x12c] ss:$24 sps:$4 sm:$0xff]   ;;  %v2934_v8 = vld [vmem:[%s4148_s3 + $0x300] ss:$24 sps:$4 sm:$0xff]  }
  0x61   :  { %2059 = vmatprep.subr.bf16.mxu0 %v2930_v10  ;;  %v2942_v10 = vld [vmem:[%s4148_s3 + $0x334] ss:$24 sps:$4 sm:$0xff]  }
  0x63   :  { %764 = vmatpush1.bf16.msra.mxu1 %v2790_v28  ;;  %v2883_v28 = vld [vmem:[%s4148_s3 + $0x158] ss:$24 sps:$4 sm:$0xff]  }
  0x64   :  { %765 = vmatprep.subr.bf16.mxu1 %v2795_v29  ;;  %2060 = vmatpush1.bf16.msra.mxu0 %v2928_v12  ;;  %v2891_v29 = vld [vmem:[%s4148_s3 + $0x18c] ss:$24 sps:$4 sm:$0xff]   ;;  %v2940_v12 = vld [vmem:[%s4148_s3 + $0x330] ss:$24 sps:$4 sm:$0xff]  }
  0x65   :  { %2072 = vmatprep.subr.bf16.mxu0 %v2936_v16  ;;  %v2946_v16 = vld [vmem:[%s4148_s3 + $0x360] ss:$24 sps:$4 sm:$0xff]  }
  0x67   :  { %766 = vmatpush1.bf16.msra.mxu1 %v2793_v32  ;;  %v2895_v32 = vld [vmem:[%s4148_s3 + $0x1b8] ss:$24 sps:$4 sm:$0xff]  }
  0x68   :  { %767 = vmatprep.subr.bf16.mxu1 %v2798_v33  ;;  %v2903_v33 = vld [vmem:[%s4148_s3 + $0x1ec] ss:$24 sps:$4 sm:$0xff]  }
  0x6b   :  { %768 = vmatpush1.bf16.msra.mxu1 %v2796_v36  ;;  %v2907_v36 = vld [vmem:[%s4148_s3 + $0x218] ss:$24 sps:$4 sm:$0xff]  }
  0x6c   :  { %769 = vmatprep.subr.bf16.mxu1 %v2801_v37  ;;  %v2915_v37 = vld [vmem:[%s4148_s3 + $0x24c] ss:$24 sps:$4 sm:$0xff]  }
  0x6f   :  { %770 = vmatpush1.bf16.msra.mxu1 %v2799_v39  ;;  %v2921_v39 = vld [vmem:[%s4148_s3 + $0x27c] ss:$24 sps:$4 sm:$0xff]  }
  0x70   :  { %771 = vmatprep.subr.bf16.mxu1 %v2804_v41  ;;  %v2927_v41 = vld [vmem:[%s4148_s3 + $0x2ac] ss:$24 sps:$4 sm:$0xff]  }
  0x73   :  { %772 = vmatpush1.bf16.msra.mxu1 %v2802_v45  ;;  %v2931_v45 = vld [vmem:[%s4148_s3 + $0x2d8] ss:$24 sps:$4 sm:$0xff]  }
  0x74   :  { %773 = vmatprep.subr.bf16.mxu1 %v2807_v46  ;;  %v2939_v46 = vld [vmem:[%s4148_s3 + $0x30c] ss:$24 sps:$4 sm:$0xff]  }
  0x77   :  { %774 = vmatpush1.bf16.msra.mxu1 %v2805_v49  ;;  %v161_v49 = vlaneseq }
  0x78   :  { %775 = vmatprep.subr.bf16.mxu1 %v2810_v50 }
  0x79   :  { %v3699_v52 = vshrl.u32 %v161_v49, 7  ;;  %v2997_v49 = vld [vmem:[%s4148_s3 + $0x4e8] ss:$24 sps:$4 sm:$0xff]  }
  0x7b   :  { %776 = vmatpush1.bf16.msra.mxu1 %v2808_v54  ;;  %v163_v54 = vsub.s32 0, %v3699_v52  ;;  %v167_v56 = vsub.s32 1, %v3699_v52 }
  0x7c   :  { %777 = vmatprep.subr.bf16.mxu1 %v2813_v55  ;;  %v3705_v55 = vld [vmem:[%s4147_s2] sm:$0xf] }
  0x7f   :  { %778 = vmatpush1.bf16.msra.mxu1 %v2811_v57  ;;  %v164_v57 = vrot.slane %v3705_v55, %v163_v54 }
  0x80   :  { %790 = vmatprep.subr.bf16.mxu1 %v2816_v58  ;;  %v168_v58 = vrot.slane %v3705_v55, %v167_v56 }
  0x82   :  { %780 = vmatmul.mubr.bf16.vlgmr.msra.gmra.mrb[4].mxu1 %v3306_v42  ;;  %v2823_v42 = vld [vmem:[%s4146_s1 + $0x268] ss:$16 sps:$4 sm:$0xff]  }
  0x83   :  { %791 = vmatpush1.bf16.msra.mxu1 %v2814_v59  ;;  %822 = vmatprep.mubr.bf16.mxu1 %v3150_v2  ;;  %v2826_v2 = vld [vmem:[%s4146_s1 + $0x288] ss:$16 sps:$4 sm:$0xff]  }
  0x84   :  { %792 = vmatprep.subr.bf16.mxu1 %v2819_v60 }
  0x87   :  { %793 = vmatpush1.bf16.msra.mxu1 %v2817_v61 }
  0x88   :  { %794 = vmatprep.subr.bf16.mxu1 %v2822_v62 }
  0x8b   :  { %795 = vmatpush1.bf16.msra.mxu1 %v2820_v63 }
  0x8c   :  { %796 = vmatprep.subr.bf16.mxu1 %v2825_v0 }
  0x8f   :  { %797 = vmatpush1.bf16.msra.mxu1 %v2823_v42 }
  0x90   :  { %798 = vmatprep.subr.bf16.mxu1 %v2828_v1 }
  0x93   :  { %799 = vmatpush1.bf16.msra.mxu1 %v2826_v2 }
  0x94   :  { %800 = vmatprep.subr.bf16.mxu1 %v2831_v3 }
  0x97   :  { %801 = vmatpush1.bf16.msra.mxu1 %v2829_v4 }
  0x98   :  { %802 = vmatprep.subr.bf16.mxu1 %v2834_v5 }
  0x9b   :  { %803 = vmatpush1.bf16.msra.mxu1 %v2832_v7 }
  0x9c   :  { %804 = vmatprep.subr.bf16.mxu1 %v2837_v9  ;;  %v2937_v9 = vld [vmem:[%s4148_s3 + $0x308] ss:$24 sps:$4 sm:$0xff]  }
  0x9f   :  { %805 = vmatpush1.bf16.msra.mxu1 %v2835_v11  ;;  %v2945_v11 = vld [vmem:[%s4148_s3 + $0x33c] ss:$24 sps:$4 sm:$0xff]  }
  0xa0   :  { %2115 = vmatprep.subr.bf16.mxu1 %v2843_v13  ;;  %v2943_v13 = vld [vmem:[%s4148_s3 + $0x338] ss:$24 sps:$4 sm:$0xff]  }
  0xa2   :  { %823 = vmatmul.mubr.bf16.vlgmr.msra.gmra.mrb[4].mxu1 %v3335_v53  ;;  %v2861_v53 = vld [vmem:[%s4148_s3 + $0x9c] ss:$24 sps:$4 sm:$0xff]  }
  0xa3   :  { %2116 = vmatpush1.bf16.msra.mxu1 %v2841_v14  ;;  %v2948_v14 = vld [vmem:[%s4148_s3 + $0x364] ss:$24 sps:$4 sm:$0xff]  }
  0xa4   :  { %2117 = vmatprep.subr.bf16.mxu1 %v2849_v15  ;;  %v2951_v15 = vld [vmem:[%s4148_s3 + $0x36c] ss:$24 sps:$4 sm:$0xff]  }
  0xa7   :  { %2118 = vmatpush1.bf16.msra.mxu1 %v2847_v17  ;;  %v2949_v17 = vld [vmem:[%s4148_s3 + $0x368] ss:$24 sps:$4 sm:$0xff]  }
  0xa8   :  { %2119 = vmatprep.subr.bf16.mxu1 %v2855_v18  ;;  %v2954_v18 = vld [vmem:[%s4148_s3 + $0x394] ss:$24 sps:$4 sm:$0xff]  }
  0xab   :  { %2120 = vmatpush1.bf16.msra.mxu1 %v2853_v19  ;;  %v2957_v19 = vld [vmem:[%s4148_s3 + $0x39c] ss:$24 sps:$4 sm:$0xff]  }
  0xac   :  { %2121 = vmatprep.subr.bf16.mxu1 %v2861_v53  ;;  %v2952_v53 = vld [vmem:[%s4148_s3 + $0x390] ss:$24 sps:$4 sm:$0xff]  }
  0xaf   :  { %2122 = vmatpush1.bf16.msra.mxu1 %v2859_v20  ;;  %v2955_v20 = vld [vmem:[%s4148_s3 + $0x398] ss:$24 sps:$4 sm:$0xff]  }
  0xb0   :  { %2123 = vmatprep.subr.bf16.mxu1 %v2867_v21  ;;  %v2960_v21 = vld [vmem:[%s4148_s3 + $0x3c4] ss:$24 sps:$4 sm:$0xff]  }
  0xb3   :  { %2124 = vmatpush1.bf16.msra.mxu1 %v2865_v22  ;;  %v2963_v22 = vld [vmem:[%s4148_s3 + $0x3cc] ss:$24 sps:$4 sm:$0xff]  }
  0xb4   :  { %2125 = vmatprep.subr.bf16.mxu1 %v2873_v23  ;;  %v2958_v23 = vld [vmem:[%s4148_s3 + $0x3c0] ss:$24 sps:$4 sm:$0xff]  }
  0xb7   :  { %2126 = vmatpush1.bf16.msra.mxu1 %v2871_v24  ;;  %v2961_v24 = vld [vmem:[%s4148_s3 + $0x3c8] ss:$24 sps:$4 sm:$0xff]  }
  0xb8   :  { %2127 = vmatprep.subr.bf16.mxu1 %v2879_v25  ;;  %v2966_v25 = vld [vmem:[%s4148_s3 + $0x3f4] ss:$24 sps:$4 sm:$0xff]  }
  0xbb   :  { %2128 = vmatpush1.bf16.msra.mxu1 %v2877_v26  ;;  %v2969_v26 = vld [vmem:[%s4148_s3 + $0x3fc] ss:$24 sps:$4 sm:$0xff]  }
  0xbc   :  { %2129 = vmatprep.subr.bf16.mxu1 %v2885_v27  ;;  %v2964_v27 = vld [vmem:[%s4148_s3 + $0x3f0] ss:$24 sps:$4 sm:$0xff]  }
  0xbf   :  { %2130 = vmatpush1.bf16.msra.mxu1 %v2883_v28  ;;  %v2967_v28 = vld [vmem:[%s4148_s3 + $0x3f8] ss:$24 sps:$4 sm:$0xff]  }
  0xc0   :  { %2131 = vmatprep.subr.bf16.mxu1 %v2891_v29  ;;  %v2972_v29 = vld [vmem:[%s4148_s3 + $0x424] ss:$24 sps:$4 sm:$0xff]  }
  0xc3   :  { %2132 = vmatpush1.bf16.msra.mxu1 %v2889_v30  ;;  %v2975_v30 = vld [vmem:[%s4148_s3 + $0x42c] ss:$24 sps:$4 sm:$0xff]  }
  0xc4   :  { %2133 = vmatprep.subr.bf16.mxu1 %v2897_v31  ;;  %v2970_v31 = vld [vmem:[%s4148_s3 + $0x420] ss:$24 sps:$4 sm:$0xff]  }
  0xc7   :  { %2134 = vmatpush1.bf16.msra.mxu1 %v2895_v32  ;;  %v2973_v32 = vld [vmem:[%s4148_s3 + $0x428] ss:$24 sps:$4 sm:$0xff]  }
  0xc8   :  { %2135 = vmatprep.subr.bf16.mxu1 %v2903_v33  ;;  %v2978_v33 = vld [vmem:[%s4148_s3 + $0x454] ss:$24 sps:$4 sm:$0xff]  }
  0xcb   :  { %2136 = vmatpush1.bf16.msra.mxu1 %v2901_v34  ;;  %v2981_v34 = vld [vmem:[%s4148_s3 + $0x45c] ss:$24 sps:$4 sm:$0xff]  }
  0xcc   :  { %2137 = vmatprep.subr.bf16.mxu1 %v2909_v35  ;;  %v2976_v35 = vld [vmem:[%s4148_s3 + $0x450] ss:$24 sps:$4 sm:$0xff]  }
  0xcf   :  { %2138 = vmatpush1.bf16.msra.mxu1 %v2907_v36  ;;  %v2979_v36 = vld [vmem:[%s4148_s3 + $0x458] ss:$24 sps:$4 sm:$0xff]  }
  0xd0   :  { %2139 = vmatprep.subr.bf16.mxu1 %v2915_v37  ;;  %v2984_v37 = vld [vmem:[%s4148_s3 + $0x484] ss:$24 sps:$4 sm:$0xff]  }
  0xd3   :  { %2140 = vmatpush1.bf16.msra.mxu1 %v2913_v38  ;;  %v2987_v38 = vld [vmem:[%s4148_s3 + $0x48c] ss:$24 sps:$4 sm:$0xff]  }
  0xd4   :  { %2141 = vmatprep.subr.bf16.mxu1 %v2921_v39  ;;  %v2982_v39 = vld [vmem:[%s4148_s3 + $0x480] ss:$24 sps:$4 sm:$0xff]  }
  0xd7   :  { %2142 = vmatpush1.bf16.msra.mxu1 %v2919_v40  ;;  %v2985_v40 = vld [vmem:[%s4148_s3 + $0x488] ss:$24 sps:$4 sm:$0xff]  }
  0xd8   :  { %2143 = vmatprep.subr.bf16.mxu1 %v2927_v41  ;;  %v2990_v41 = vld [vmem:[%s4148_s3 + $0x4b4] ss:$24 sps:$4 sm:$0xff]  }
  0xdb   :  { %2144 = vmatpush1.bf16.msra.mxu1 %v2925_v43  ;;  %v2993_v43 = vld [vmem:[%s4148_s3 + $0x4bc] ss:$24 sps:$4 sm:$0xff]  }
  0xdc   :  { %2145 = vmatprep.subr.bf16.mxu1 %v2933_v44  ;;  %v2988_v44 = vld [vmem:[%s4148_s3 + $0x4b0] ss:$24 sps:$4 sm:$0xff]  }
  0xdf   :  { %2146 = vmatpush1.bf16.msra.mxu1 %v2931_v45  ;;  %v2991_v45 = vld [vmem:[%s4148_s3 + $0x4b8] ss:$24 sps:$4 sm:$0xff]  }
  0xe0   :  { %2158 = vmatprep.subr.bf16.mxu1 %v2939_v46  ;;  %v2996_v46 = vld [vmem:[%s4148_s3 + $0x4e4] ss:$24 sps:$4 sm:$0xff]  }
  0xfa   :  { %v738_v47 = vpop.f32.mrb[0].mxu0 }
  0xfb   :  { %v740_v48 = vpop.f32.mrb[1].mxu0 }
  0xfc   :  { %v742_v50 = vpop.f32.mrb[2].mxu0 }
  0xfd   :  { %v744_v51 = vpop.f32.mrb[3].mxu0 }
 0x115   :  { %v695_v59 = vpop.f32.mrb[0].mxu1 }
 0x116   :  { %v696_v60 = vadd.f32 %v695_v59, %v164_v57  ;;  %v697_v61 = vpop.f32.mrb[1].mxu1  ;;  %v3008_v59 = vld [vmem:[%s4148_s3 + $0x544] ss:$24 sps:$4 sm:$0xff]  }
 0x117   :  { %v698_v62 = vadd.f32 %v697_v61, %v168_v58  ;;  %v699_v63 = vpop.f32.mrb[2].mxu1  ;;  %v3006_v61 = vld [vmem:[%s4148_s3 + $0x540] ss:$24 sps:$4 sm:$0xff]  }
 0x118   :  { %v700_v0 = vadd.f32 %v699_v63, %v164_v57  ;;  %v739_v42 = vadd.f32 %v738_v47, %v696_v60  ;;  %v701_v1 = vpop.f32.mrb[3].mxu1  ;;  %v2999_v47 = vld [vmem:[%s4148_s3 + $0x4ec] ss:$24 sps:$4 sm:$0xff]   ;;  %v3000_v57 = vld [vmem:[%s4148_s3 + $0x510] ss:$24 sps:$4 sm:$0xff]  }
 0x119   :  { %v702_v2 = vadd.f32 %v701_v1, %v168_v58  ;;  %v741_v3 = vadd.f32 %v740_v48, %v698_v62  ;;  %v2994_v48 = vld [vmem:[%s4148_s3 + $0x4e0] ss:$24 sps:$4 sm:$0xff]   ;;  %v3011_v60 = vld [vmem:[%s4148_s3 + $0x54c] ss:$24 sps:$4 sm:$0xff]  }
 0x11a   :  { %v743_v4 = vadd.f32 %v742_v50, %v700_v0  ;;  %v3002_v50 = vld [vmem:[%s4148_s3 + $0x514] ss:$24 sps:$4 sm:$0xff]   ;;  %v3003_v58 = vld [vmem:[%s4148_s3 + $0x518] ss:$24 sps:$4 sm:$0xff]   ;;  %v3009_v62 = vld [vmem:[%s4148_s3 + $0x548] ss:$24 sps:$4 sm:$0xff]  }
 0x11b   :  { %v745_v5 = vadd.f32 %v744_v51, %v702_v2  ;;  %v3005_v51 = vld [vmem:[%s4148_s3 + $0x51c] ss:$24 sps:$4 sm:$0xff]   ;;  %v3015_v1 = vld [vmem:[%s4148_s3 + $0x578] ss:$24 sps:$4 sm:$0xff]  }
 0x11c   :  { %v3714_v6 = vpack.c.bf16 %v743_v4, %v739_v42  ;;  %v3014_v63 = vld [vmem:[%s4148_s3 + $0x574] ss:$24 sps:$4 sm:$0xff]   ;;  %v3012_v42 = vld [vmem:[%s4148_s3 + $0x570] ss:$24 sps:$4 sm:$0xff]   ;;  %v3020_v2 = vld [vmem:[%s4148_s3 + $0x5a4] ss:$24 sps:$4 sm:$0xff]  }
 0x11d   :  { %v3716_v7 = vpack.c.bf16 %v745_v5, %v741_v3  ;;  %v3017_v0 = vld [vmem:[%s4148_s3 + $0x57c] ss:$24 sps:$4 sm:$0xff]   ;;  %v3023_v3 = vld [vmem:[%s4148_s3 + $0x5ac] ss:$24 sps:$4 sm:$0xff]   ;;  %v3018_v4 = vld [vmem:[%s4148_s3 + $0x5a0] ss:$24 sps:$4 sm:$0xff]  }
 0x11e   :  { %v3021_v5 = vld [vmem:[%s4148_s3 + $0x5a8] ss:$24 sps:$4 sm:$0xff]  }
 0x11f   :  { %2061 = vmatprep.mubr.bf16.mxu0 %v3716_v7  ;;  %2147 = vmatprep.mubr.bf16.mxu1 %v3716_v7 }
 0x120   :  { %2062 = vmatmul.mubr.bf16.vlgmr.msra.gmra.mrb[4].mxu0 %v3714_v6  ;;  %2148 = vmatmul.mubr.bf16.vlgmr.msra.gmra.mrb[8].mxu1 %v3714_v6 }
 0x121   :  { %2073 = vmatpush1.bf16.msra.mxu0 %v2934_v8  ;;  %2159 = vmatpush1.bf16.msra.mxu1 %v2937_v9  ;;  %v3026_v8 = vld [vmem:[%s4148_s3 + $0x5d4] ss:$24 sps:$4 sm:$0xff]  }
 0x122   :  { %2074 = vmatprep.subr.bf16.mxu0 %v2942_v10  ;;  %2160 = vmatprep.subr.bf16.mxu1 %v2945_v11  ;;  %v3029_v9 = vld [vmem:[%s4148_s3 + $0x5dc] ss:$24 sps:$4 sm:$0xff]   ;;  %v3024_v10 = vld [vmem:[%s4148_s3 + $0x5d0] ss:$24 sps:$4 sm:$0xff]  }
 0x123   :  { %v3027_v11 = vld [vmem:[%s4148_s3 + $0x5d8] ss:$24 sps:$4 sm:$0xff]  }
 0x125   :  { %2075 = vmatpush1.bf16.msra.mxu0 %v2940_v12  ;;  %2161 = vmatpush1.bf16.msra.mxu1 %v2943_v13  ;;  %v3032_v12 = vld [vmem:[%s4148_s3 + $0x14] ss:$24 sps:$4 sm:$0xff]   ;;  %v171_v13 = vsub.s32 2, %v3699_v52 }
 0x126   :  { %2076 = vmatprep.subr.bf16.mxu0 %v2948_v14  ;;  %2162 = vmatprep.subr.bf16.mxu1 %v2951_v15  ;;  %v175_v14 = vsub.s32 3, %v3699_v52 }
 0x127   :  { %v172_v15 = vrot.slane %v3705_v55, %v171_v13 }
 0x129   :  { %2077 = vmatpush1.bf16.msra.mxu0 %v2946_v16  ;;  %2163 = vmatpush1.bf16.msra.mxu1 %v2949_v17  ;;  %v176_v17 = vrot.slane %v3705_v55, %v175_v14  ;;  %v3033_v55 = vld [vmem:[%s4148_s3 + $0x40] ss:$24 sps:$4 sm:$0xff]  }
 0x12a   :  { %2078 = vmatprep.subr.bf16.mxu0 %v2954_v18  ;;  %2164 = vmatprep.subr.bf16.mxu1 %v2957_v19 }
 0x12d   :  { %2079 = vmatpush1.bf16.msra.mxu0 %v2952_v53  ;;  %2165 = vmatpush1.bf16.msra.mxu1 %v2955_v20 }
 0x12e   :  { %2080 = vmatprep.subr.bf16.mxu0 %v2960_v21  ;;  %2166 = vmatprep.subr.bf16.mxu1 %v2963_v22 }
 0x131   :  { %2081 = vmatpush1.bf16.msra.mxu0 %v2958_v23  ;;  %2167 = vmatpush1.bf16.msra.mxu1 %v2961_v24 }
 0x132   :  { %2082 = vmatprep.subr.bf16.mxu0 %v2966_v25  ;;  %2168 = vmatprep.subr.bf16.mxu1 %v2969_v26  ;;  %v3030_v26 = vld [vmem:[%s4148_s3 + $0x10] ss:$24 sps:$4 sm:$0xff]  }
 0x135   :  { %2083 = vmatpush1.bf16.msra.mxu0 %v2964_v27  ;;  %2169 = vmatpush1.bf16.msra.mxu1 %v2967_v28  ;;  %v3035_v27 = vld [vmem:[%s4148_s3 + $0x44] ss:$24 sps:$4 sm:$0xff]   ;;  %v3038_v28 = vld [vmem:[%s4148_s3 + $0x74] ss:$24 sps:$4 sm:$0xff]  }
 0x136   :  { %2084 = vmatprep.subr.bf16.mxu0 %v2972_v29  ;;  %2170 = vmatprep.subr.bf16.mxu1 %v2975_v30  ;;  %v3036_v29 = vld [vmem:[%s4148_s3 + $0x70] ss:$24 sps:$4 sm:$0xff]   ;;  %v3041_v30 = vld [vmem:[%s4148_s3 + $0xa4] ss:$24 sps:$4 sm:$0xff]  }
 0x139   :  { %2085 = vmatpush1.bf16.msra.mxu0 %v2970_v31  ;;  %2171 = vmatpush1.bf16.msra.mxu1 %v2973_v32  ;;  %v3044_v31 = vld [vmem:[%s4148_s3 + $0xd4] ss:$24 sps:$4 sm:$0xff]   ;;  %v3042_v32 = vld [vmem:[%s4148_s3 + $0xd0] ss:$24 sps:$4 sm:$0xff]  }
 0x13a   :  { %2086 = vmatprep.subr.bf16.mxu0 %v2978_v33  ;;  %2172 = vmatprep.subr.bf16.mxu1 %v2981_v34  ;;  %v3047_v33 = vld [vmem:[%s4148_s3 + $0x104] ss:$24 sps:$4 sm:$0xff]   ;;  %v3045_v34 = vld [vmem:[%s4148_s3 + $0x100] ss:$24 sps:$4 sm:$0xff]  }
 0x13d   :  { %2087 = vmatpush1.bf16.msra.mxu0 %v2976_v35  ;;  %2173 = vmatpush1.bf16.msra.mxu1 %v2979_v36  ;;  %v3050_v35 = vld [vmem:[%s4148_s3 + $0x134] ss:$24 sps:$4 sm:$0xff]   ;;  %v3048_v36 = vld [vmem:[%s4148_s3 + $0x130] ss:$24 sps:$4 sm:$0xff]  }
 0x13e   :  { %2088 = vmatprep.subr.bf16.mxu0 %v2984_v37  ;;  %2174 = vmatprep.subr.bf16.mxu1 %v2987_v38  ;;  %v3053_v37 = vld [vmem:[%s4148_s3 + $0x164] ss:$24 sps:$4 sm:$0xff]   ;;  %v3051_v38 = vld [vmem:[%s4148_s3 + $0x160] ss:$24 sps:$4 sm:$0xff]  }
 0x141   :  { %2089 = vmatpush1.bf16.msra.mxu0 %v2982_v39  ;;  %2175 = vmatpush1.bf16.msra.mxu1 %v2985_v40  ;;  %v3056_v39 = vld [vmem:[%s4148_s3 + $0x194] ss:$24 sps:$4 sm:$0xff]   ;;  %v3054_v40 = vld [vmem:[%s4148_s3 + $0x190] ss:$24 sps:$4 sm:$0xff]  }
 0x142   :  { %2090 = vmatprep.subr.bf16.mxu0 %v2990_v41  ;;  %2176 = vmatprep.subr.bf16.mxu1 %v2993_v43  ;;  %v3059_v41 = vld [vmem:[%s4148_s3 + $0x1c4] ss:$24 sps:$4 sm:$0xff]   ;;  %v3057_v43 = vld [vmem:[%s4148_s3 + $0x1c0] ss:$24 sps:$4 sm:$0xff]  }
 0x145   :  { %2091 = vmatpush1.bf16.msra.mxu0 %v2988_v44  ;;  %2177 = vmatpush1.bf16.msra.mxu1 %v2991_v45  ;;  %v3062_v44 = vld [vmem:[%s4148_s3 + $0x1f4] ss:$24 sps:$4 sm:$0xff]   ;;  %v3060_v45 = vld [vmem:[%s4148_s3 + $0x1f0] ss:$24 sps:$4 sm:$0xff]  }
 0x146   :  { %2092 = vmatprep.subr.bf16.mxu0 %v2996_v46  ;;  %2178 = vmatprep.subr.bf16.mxu1 %v2999_v47  ;;  %v3065_v46 = vld [vmem:[%s4148_s3 + $0x224] ss:$24 sps:$4 sm:$0xff]   ;;  %v3063_v47 = vld [vmem:[%s4148_s3 + $0x220] ss:$24 sps:$4 sm:$0xff]  }
 0x149   :  { %2093 = vmatpush1.bf16.msra.mxu0 %v2994_v48  ;;  %2179 = vmatpush1.bf16.msra.mxu1 %v2997_v49  ;;  %v3068_v48 = vld [vmem:[%s4148_s3 + $0x254] ss:$24 sps:$4 sm:$0xff]   ;;  %v3066_v49 = vld [vmem:[%s4148_s3 + $0x250] ss:$24 sps:$4 sm:$0xff]  }
 0x14a   :  { %2094 = vmatprep.subr.bf16.mxu0 %v3002_v50  ;;  %2180 = vmatprep.subr.bf16.mxu1 %v3005_v51  ;;  %v3071_v50 = vld [vmem:[%s4148_s3 + $0x284] ss:$24 sps:$4 sm:$0xff]   ;;  %v3069_v51 = vld [vmem:[%s4148_s3 + $0x280] ss:$24 sps:$4 sm:$0xff]  }
 0x14d   :  { %2095 = vmatpush1.bf16.msra.mxu0 %v3000_v57  ;;  %2181 = vmatpush1.bf16.msra.mxu1 %v3003_v58  ;;  %v3074_v57 = vld [vmem:[%s4148_s3 + $0x2b4] ss:$24 sps:$4 sm:$0xff]   ;;  %v3072_v58 = vld [vmem:[%s4148_s3 + $0x2b0] ss:$24 sps:$4 sm:$0xff]  }
 0x14e   :  { %2096 = vmatprep.subr.bf16.mxu0 %v3008_v59  ;;  %2182 = vmatprep.subr.bf16.mxu1 %v3011_v60  ;;  %v3077_v59 = vld [vmem:[%s4148_s3 + $0x2e4] ss:$24 sps:$4 sm:$0xff]   ;;  %v3075_v60 = vld [vmem:[%s4148_s3 + $0x2e0] ss:$24 sps:$4 sm:$0xff]  }
 0x151   :  { %2097 = vmatpush1.bf16.msra.mxu0 %v3006_v61  ;;  %2183 = vmatpush1.bf16.msra.mxu1 %v3009_v62  ;;  %v3080_v61 = vld [vmem:[%s4148_s3 + $0x314] ss:$24 sps:$4 sm:$0xff]   ;;  %v3078_v62 = vld [vmem:[%s4148_s3 + $0x310] ss:$24 sps:$4 sm:$0xff]  }
 0x152   :  { %2098 = vmatprep.subr.bf16.mxu0 %v3014_v63  ;;  %2184 = vmatprep.subr.bf16.mxu1 %v3017_v0  ;;  %v3083_v63 = vld [vmem:[%s4148_s3 + $0x344] ss:$24 sps:$4 sm:$0xff]   ;;  %v3081_v0 = vld [vmem:[%s4148_s3 + $0x340] ss:$24 sps:$4 sm:$0xff]  }
 0x155   :  { %2099 = vmatpush1.bf16.msra.mxu0 %v3012_v42  ;;  %2185 = vmatpush1.bf16.msra.mxu1 %v3015_v1  ;;  %v3086_v42 = vld [vmem:[%s4148_s3 + $0x374] ss:$24 sps:$4 sm:$0xff]   ;;  %v3084_v1 = vld [vmem:[%s4148_s3 + $0x370] ss:$24 sps:$4 sm:$0xff]  }
 0x156   :  { %2100 = vmatprep.subr.bf16.mxu0 %v3020_v2  ;;  %2186 = vmatprep.subr.bf16.mxu1 %v3023_v3  ;;  %v3087_v2 = vld [vmem:[%s4148_s3 + $0x3a0] ss:$24 sps:$4 sm:$0xff]   ;;  %v3092_v3 = vld [vmem:[%s4148_s3 + $0x3d4] ss:$24 sps:$4 sm:$0xff]  }
 0x159   :  { %2101 = vmatpush1.bf16.msra.mxu0 %v3018_v4  ;;  %2187 = vmatpush1.bf16.msra.mxu1 %v3021_v5  ;;  %v3090_v4 = vld [vmem:[%s4148_s3 + $0x3d0] ss:$24 sps:$4 sm:$0xff]   ;;  %v3095_v5 = vld [vmem:[%s4148_s3 + $0x404] ss:$24 sps:$4 sm:$0xff]  }
 0x15a   :  { %2102 = vmatprep.subr.bf16.mxu0 %v3026_v8  ;;  %2188 = vmatprep.subr.bf16.mxu1 %v3029_v9  ;;  %v3093_v8 = vld [vmem:[%s4148_s3 + $0x400] ss:$24 sps:$4 sm:$0xff]   ;;  %v3098_v9 = vld [vmem:[%s4148_s3 + $0x434] ss:$24 sps:$4 sm:$0xff]  }
 0x15d   :  { %2103 = vmatpush1.bf16.msra.mxu0 %v3024_v10  ;;  %2189 = vmatpush1.bf16.msra.mxu1 %v3027_v11  ;;  %v3096_v10 = vld [vmem:[%s4148_s3 + $0x430] ss:$24 sps:$4 sm:$0xff]   ;;  %v3101_v11 = vld [vmem:[%s4148_s3 + $0x464] ss:$24 sps:$4 sm:$0xff]  }
 0x15e   :  { %2201 = vmatprep.subr.bf16.mxu0 %v3032_v12  ;;  %v3099_v12 = vld [vmem:[%s4148_s3 + $0x460] ss:$24 sps:$4 sm:$0xff]  }
 0x175   :  { %v824_v16 = vpop.f32.mrb[4].mxu1 }
 0x176   :  { %v826_v18 = vpop.f32.mrb[5].mxu1  ;;  %v2650_v53 = vadd.f32 %v824_v16, %v172_v15  ;;  %v3102_v16 = vld [vmem:[%s4148_s3 + $0x490] ss:$24 sps:$4 sm:$0xff]  }
 0x177   :  { %v828_v19 = vpop.f32.mrb[6].mxu1  ;;  %v2651_v22 = vadd.f32 %v826_v18, %v176_v17  ;;  %v3105_v18 = vld [vmem:[%s4148_s3 + $0x4c0] ss:$24 sps:$4 sm:$0xff]  }
 0x178   :  { %v2652_v20 = vadd.f32 %v828_v19, %v172_v15  ;;  %v830_v21 = vpop.f32.mrb[7].mxu1  ;;  %v3104_v15 = vld [vmem:[%s4148_s3 + $0x494] ss:$24 sps:$4 sm:$0xff]  }
 0x179   :  { %v2653_v23 = vadd.f32 %v830_v21, %v176_v17  ;;  %v3107_v17 = vld [vmem:[%s4148_s3 + $0x4c4] ss:$24 sps:$4 sm:$0xff]   ;;  %v3110_v19 = vld [vmem:[%s4148_s3 + $0x4f4] ss:$24 sps:$4 sm:$0xff]   ;;  %v3111_v21 = vld [vmem:[%s4148_s3 + $0x520] ss:$24 sps:$4 sm:$0xff]  }
 0x17a   :  { %v3919_v24 = vpack.c.bf16 %v2652_v20, %v2650_v53  ;;  %v3108_v53 = vld [vmem:[%s4148_s3 + $0x4f0] ss:$24 sps:$4 sm:$0xff]   ;;  %v3113_v20 = vld [vmem:[%s4148_s3 + $0x524] ss:$24 sps:$4 sm:$0xff]  }
 0x17b   :  { %v3921_v25 = vpack.c.bf16 %v2653_v23, %v2651_v22  ;;  %v3116_v22 = vld [vmem:[%s4148_s3 + $0x554] ss:$24 sps:$4 sm:$0xff]   ;;  %v3114_v23 = vld [vmem:[%s4148_s3 + $0x550] ss:$24 sps:$4 sm:$0xff]  }
 0x17d   :  { %2104 = vmatprep.mubr.bf16.mxu0 %v3921_v25  ;;  %2190 = vmatprep.mubr.bf16.mxu1 %v3921_v25 }
 0x17e   :  { %2105 = vmatmul.mubr.bf16.vlgmr.msra.gmra.mrb[4].mxu0 %v3919_v24  ;;  %2191 = vmatmul.mubr.bf16.vlgmr.msra.gmra.mrb[8].mxu1 %v3919_v24 }
 0x17f   :  { %2202 = vmatpush1.bf16.msra.mxu0 %v3030_v26  ;;  %2233 = vmatprep.mubr.bf16.mxu0 %v3716_v7  ;;  %v3039_v7 = vld [vmem:[%s4148_s3 + $0xa0] ss:$24 sps:$4 sm:$0xff]  }
 0x180   :  { %2203 = vmatprep.subr.bf16.mxu0 %v3035_v27  ;;  %v3117_v26 = vld [vmem:[%s4148_s3 + $0x580] ss:$24 sps:$4 sm:$0xff]   ;;  %v3122_v27 = vld [vmem:[%s4148_s3 + $0x5b4] ss:$24 sps:$4 sm:$0xff]  }
 0x183   :  { %2204 = vmatpush1.bf16.msra.mxu0 %v3033_v55  ;;  %v3120_v55 = vld [vmem:[%s4148_s3 + $0x5b0] ss:$24 sps:$4 sm:$0xff]  }
 0x184   :  { %2205 = vmatprep.subr.bf16.mxu0 %v3038_v28  ;;  %v3125_v28 = vld [vmem:[%s4148_s3 + $0x5e4] ss:$24 sps:$4 sm:$0xff]  }
 0x187   :  { %2206 = vmatpush1.bf16.msra.mxu0 %v3036_v29  ;;  %v3123_v29 = vld [vmem:[%s4148_s3 + $0x5e0] ss:$24 sps:$4 sm:$0xff]  }
 0x188   :  { %2207 = vmatprep.subr.bf16.mxu0 %v3041_v30  ;;  %v1037_v30 = vld [vmem:[%s4149_s4] sm:$0x3f] }
 0x18b   :  { %2208 = vmatpush1.bf16.msra.mxu0 %v3039_v7  ;;  %v1042_v7 = vrot.slane %v1037_v30, %v163_v54 }
 0x18c   :  { %2209 = vmatprep.subr.bf16.mxu0 %v3044_v31  ;;  %v1050_v31 = vrot.slane %v1037_v30, %v171_v13 }
 0x18f   :  { %2210 = vmatpush1.bf16.msra.mxu0 %v3042_v32  ;;  %v1046_v32 = vrot.slane %v1037_v30, %v167_v56 }
 0x190   :  { %2211 = vmatprep.subr.bf16.mxu0 %v3047_v33  ;;  %v1054_v33 = vrot.slane %v1037_v30, %v175_v14 }
 0x193   :  { %2212 = vmatpush1.bf16.msra.mxu0 %v3045_v34 }
 0x194   :  { %2213 = vmatprep.subr.bf16.mxu0 %v3050_v35 }
 0x197   :  { %2214 = vmatpush1.bf16.msra.mxu0 %v3048_v36 }
 0x198   :  { %2215 = vmatprep.subr.bf16.mxu0 %v3053_v37 }
 0x19b   :  { %2216 = vmatpush1.bf16.msra.mxu0 %v3051_v38 }
 0x19c   :  { %2217 = vmatprep.subr.bf16.mxu0 %v3056_v39 }
 0x19f   :  { %2218 = vmatpush1.bf16.msra.mxu0 %v3054_v40 }
 0x1a0   :  { %2219 = vmatprep.subr.bf16.mxu0 %v3059_v41 }
 0x1a3   :  { %2220 = vmatpush1.bf16.msra.mxu0 %v3057_v43 }
 0x1a4   :  { %2221 = vmatprep.subr.bf16.mxu0 %v3062_v44 }
 0x1a7   :  { %2222 = vmatpush1.bf16.msra.mxu0 %v3060_v45 }
 0x1a8   :  { %2223 = vmatprep.subr.bf16.mxu0 %v3065_v46 }
 0x1ab   :  { %2224 = vmatpush1.bf16.msra.mxu0 %v3063_v47 }
 0x1ac   :  { %2225 = vmatprep.subr.bf16.mxu0 %v3068_v48 }
 0x1af   :  { %2226 = vmatpush1.bf16.msra.mxu0 %v3066_v49 }
 0x1b0   :  { %2227 = vmatprep.subr.bf16.mxu0 %v3071_v50 }
 0x1b3   :  { %2228 = vmatpush1.bf16.msra.mxu0 %v3069_v51 }
 0x1b4   :  { %2229 = vmatprep.subr.bf16.mxu0 %v3074_v57 }
 0x1b7   :  { %2230 = vmatpush1.bf16.msra.mxu0 %v3072_v58 }
 0x1b8   :  { %2231 = vmatprep.subr.bf16.mxu0 %v3077_v59  ;;  %v1057_v59 = vsub.s32 4, %v3699_v52 }
 0x1bb   :  { %2232 = vmatpush1.bf16.msra.mxu0 %v3075_v60  ;;  %v1061_v60 = vsub.s32 5, %v3699_v52 }
 0x1bc   :  { %2244 = vmatprep.subr.bf16.mxu0 %v3080_v61  ;;  %v1058_v61 = vrot.slane %v1037_v30, %v1057_v59 }
 0x1be   :  { %2234 = vmatmul.mubr.bf16.vlgmr.msra.gmra.mrb[8].mxu0 %v3714_v6  ;;  %v3089_v6 = vld [vmem:[%s4148_s3 + $0x3a4] ss:$24 sps:$4 sm:$0xff]  }
 0x1bf   :  { %2245 = vmatpush1.bf16.msra.mxu0 %v3078_v62  ;;  %2276 = vmatprep.mubr.bf16.mxu0 %v3921_v25  ;;  %v3119_v25 = vld [vmem:[%s4148_s3 + $0x584] ss:$24 sps:$4 sm:$0xff]   ;;  %v1062_v62 = vrot.slane %v1037_v30, %v1061_v60 }
 0x1c0   :  { %2246 = vmatprep.subr.bf16.mxu0 %v3083_v63 }
 0x1c3   :  { %2247 = vmatpush1.bf16.msra.mxu0 %v3081_v0 }
 0x1c4   :  { %2248 = vmatprep.subr.bf16.mxu0 %v3086_v42 }
 0x1c7   :  { %2249 = vmatpush1.bf16.msra.mxu0 %v3084_v1 }
 0x1c8   :  { %2250 = vmatprep.subr.bf16.mxu0 %v3089_v6 }
 0x1cb   :  { %2251 = vmatpush1.bf16.msra.mxu0 %v3087_v2 }
 0x1cc   :  { %2252 = vmatprep.subr.bf16.mxu0 %v3092_v3 }
 0x1cf   :  { %2253 = vmatpush1.bf16.msra.mxu0 %v3090_v4 }
 0x1d0   :  { %2254 = vmatprep.subr.bf16.mxu0 %v3095_v5 }
 0x1d3   :  { %2255 = vmatpush1.bf16.msra.mxu0 %v3093_v8 }
 0x1d4   :  { %2256 = vmatprep.subr.bf16.mxu0 %v3098_v9 }
 0x1d7   :  { %2257 = vmatpush1.bf16.msra.mxu0 %v3096_v10 }
 0x1d8   :  { %2258 = vmatprep.subr.bf16.mxu0 %v3101_v11 }
 0x1db   :  { %2259 = vmatpush1.bf16.msra.mxu0 %v3099_v12 }
 0x1dc   :  { %2260 = vmatprep.subr.bf16.mxu0 %v3104_v15 }
 0x1df   :  { %2261 = vmatpush1.bf16.msra.mxu0 %v3102_v16 }
 0x1e0   :  { %2262 = vmatprep.subr.bf16.mxu0 %v3107_v17 }
 0x1e3   :  { %2263 = vmatpush1.bf16.msra.mxu0 %v3105_v18 }
 0x1e4   :  { %2264 = vmatprep.subr.bf16.mxu0 %v3110_v19 }
 0x1e7   :  { %2265 = vmatpush1.bf16.msra.mxu0 %v3108_v53 }
 0x1e8   :  { %2266 = vmatprep.subr.bf16.mxu0 %v3113_v20 }
 0x1eb   :  { %2267 = vmatpush1.bf16.msra.mxu0 %v3111_v21 }
 0x1ec   :  { %2268 = vmatprep.subr.bf16.mxu0 %v3116_v22 }
 0x1ef   :  { %2269 = vmatpush1.bf16.msra.mxu0 %v3114_v23 }
 0x1f0   :  { %2270 = vmatprep.subr.bf16.mxu0 %v3119_v25 }
 0x1f3   :  { %2271 = vmatpush1.bf16.msra.mxu0 %v3117_v26 }
 0x1f4   :  { %2272 = vmatprep.subr.bf16.mxu0 %v3122_v27 }
 0x1f7   :  { %2273 = vmatpush1.bf16.msra.mxu0 %v3120_v55 }
 0x1f8   :  { %2274 = vmatprep.subr.bf16.mxu0 %v3125_v28 }
 0x1fb   :  { %2275 = vmatpush1.bf16.msra.mxu0 %v3123_v29 }
 0x1fe   :  { %2277 = vmatmul.mubr.bf16.vlgmr.msra.gmra.mrb[8].mxu0 %v3919_v24 }
 0x251   :  { %v2106_v34 = vpop.f32.mrb[4].mxu0  ;;  %v2192_v35 = vpop.f32.mrb[8].mxu1 }
 0x252   :  { %v2654_v36 = vadd.f32 %v2106_v34, %v1042_v7  ;;  %v2658_v24 = vadd.f32 %v2192_v35, %v1050_v31  ;;  %v2108_v37 = vpop.f32.mrb[5].mxu0  ;;  %v2194_v38 = vpop.f32.mrb[9].mxu1 }
 0x253   :  { %v2655_v39 = vadd.f32 %v2108_v37, %v1046_v32  ;;  %v2659_v40 = vadd.f32 %v2194_v38, %v1054_v33  ;;  %v2110_v41 = vpop.f32.mrb[6].mxu0  ;;  %v2196_v43 = vpop.f32.mrb[10].mxu1 }
 0x254   :  { %v2656_v54 = vadd.f32 %v2110_v41, %v1042_v7  ;;  %v2660_v44 = vadd.f32 %v2196_v43, %v1050_v31  ;;  %v2112_v45 = vpop.f32.mrb[7].mxu0  ;;  %v2198_v13 = vpop.f32.mrb[11].mxu1 }
 0x255   :  { %v2299_v46 = vcombine.low %v2654_v36, %v2655_v39  ;;  %v2300_v47 = vcombine.high %v2654_v36, %v2655_v39  ;;  %v2301_v56 = vcombine.low %v2658_v24, %v2659_v40  ;;  %v2302_v48 = vcombine.high %v2658_v24, %v2659_v40 }
 0x256   :  { %v2657_v49 = vadd.f32 %v2112_v45, %v1046_v32  ;;  %v2661_v14 = vadd.f32 %v2198_v13, %v1054_v33 }
 0x257   :  { %2323 = vst [vmem:[#allocation4] sm:$0xff] %v2299_v46  ;;  %2329 = vst [vmem:[#allocation4 + $0x18] sm:$0xff] %v2300_v47 }
 0x258   :  { %2324 = vst [vmem:[#allocation4 + $0x8] sm:$0xff] %v2301_v56  ;;  %2330 = vst [vmem:[#allocation4 + $0x20] sm:$0xff] %v2302_v48  ;;  %v2305_v50 = vcombine.low %v2656_v54, %v2657_v49  ;;  %v2306_v51 = vcombine.high %v2656_v54, %v2657_v49  ;;  %v2307_v57 = vcombine.low %v2660_v44, %v2661_v14 }
 0x259   :  { %v2308_v58 = vcombine.high %v2660_v44, %v2661_v14 }
 0x25a   :  { %2332 = vst [vmem:[#allocation4 + $0x30] sm:$0xff] %v2305_v50  ;;  %2335 = vst [vmem:[#allocation4 + $0x48] sm:$0xff] %v2306_v51 }
 0x25b   :  { %2333 = vst [vmem:[#allocation4 + $0x38] sm:$0xff] %v2307_v57  ;;  %2336 = vst [vmem:[#allocation4 + $0x50] sm:$0xff] %v2308_v58 }
 0x2d1   :  { %v2278_v63 = vpop.f32.mrb[8].mxu0 }
 0x2d2   :  { %v2662_v0 = vadd.f32 %v2278_v63, %v1058_v61  ;;  %v2280_v42 = vpop.f32.mrb[9].mxu0 }
 0x2d3   :  { %v2663_v1 = vadd.f32 %v2280_v42, %v1062_v62  ;;  %v2282_v6 = vpop.f32.mrb[10].mxu0 }
 0x2d4   :  { %v2664_v2 = vadd.f32 %v2282_v6, %v1058_v61  ;;  %v2284_v3 = vpop.f32.mrb[11].mxu0 }
 0x2d5   :  { %v2303_v4 = vcombine.low %v2662_v0, %v2663_v1  ;;  %v2304_v5 = vcombine.high %v2662_v0, %v2663_v1  ;;  %v2665_v8 = vadd.f32 %v2284_v3, %v1062_v62 }
 0x2d7   :  { %2328 = vst.msk [vmem:[#allocation4 + $0x10] sm:$0xff] %vm2327_vm3, %v2303_v4  ;;  %2331 = vst.msk [vmem:[#allocation4 + $0x28] sm:$0xff] %vm2327_vm3, %v2304_v5  ;;  %v2309_v9 = vcombine.low %v2664_v2, %v2665_v8  ;;  %v2310_v10 = vcombine.high %v2664_v2, %v2665_v8 }
 0x2d9   :  { %2334 = vst.msk [vmem:[#allocation4 + $0x40] sm:$0xff] %vm2327_vm3, %v2309_v9  ;;  %2337 = vst.msk [vmem:[#allocation4 + $0x58] sm:$0xff] %vm2327_vm3, %v2310_v10 }
 0x2da   :  { %2342 = vsyncadd [#allocation5], 1152  ;;  %s3151_s3 = smov [#allocation4]  }
 0x2db   :  { %s2343_s4 = sshll.u32 %s3151_s3, 4  ;;  %s2344_s4 = int_to_ptr.vmem [resolvable:$true] %s2343_s4 }
 0x2dc   :  { %s3126_s19 = scalar_lea.vmem %s2344_s4, 384  ;;  %s3130_s20 = scalar_lea.vmem %s2344_s4, 1536 }
 0x2dd   :  { %p3127_p0 = scmp.ne.s32.totalorder %s2344_s4, %s3126_s19  ;;  %p3131_p1 = scmp.lt.s32.totalorder %s2344_s4, %s2344_s4 }
 0x2de   :  { %p3132_p2 = scmp.lt.s32.totalorder %s3130_s20, %s3126_s19 }
 0x2e0   :  { %p3133_p3 = por %p3132_p2, %p3131_p1 }
 0x2e2   :  { %p3134_p4 = pnand %p3133_p3, %p3127_p0 }
 0x2e4   :  { %3137 = shalt.err (!%p3134_p4)
}
 0x2e5   :  { %s3138_s23 = scalar_lea.hbm %s4150_s5, 384 }
 0x2e6   :  { %p3139_p5 = scmp.ne.s32.totalorder %s4150_s5, %s3138_s23  ;;  %p3142_p6 = scmp.lt.u32.totalorder %s3138_s23, %s4150_s5 }
 0x2e8   :  { %p3144_p7 = pnand %p3142_p6, %p3139_p5 }
 0x2ea   :  { %3147 = shalt.err (!%p3144_p7)
}
 0x2eb   :  { %s3152_s28 = smov 384   ;;  %s3153_s29 = smov 24  }
 0x2ec   :  { %2349 = dma.vmem_to_hbm [thread:$0]  %s2344_s4, 384, %s4150_s5, [#allocation5], %s3152_s28, %s3152_s28, %s3153_s29  }
 0x2ed   :  { %3148 = dma.done.wait [#allocation5], 1536  }
 0x2ee   :  { %3149 = vsyncadd [#allocation5], 4294965760 }
 0x2ef   :  { %2353 = vsyncpa [#allocation5], 1 }

</bundles_post_ra>
